<compile_context>
chip_gen: v7x
topology: tpu7x:2x2x1
jax: 0.10.0
libtpu: 0.0.40
codegen_flags: <defaults>
</compile_context>

<pallas_src>
import functools

import jax
import jax.numpy as jnp
from jax.experimental import pallas as pl
from jax.experimental.pallas import tpu as pltpu


def _prenorm_kernel(x_ref, g_ref, b_ref, w_ref, wb_ref, o_ref, *, d_real, d_pad):
    # x_ref: (TM, Dp) token tile (lanes >= d_real are zero-padded);
    # g/b/wb: (1, Dp) with zero padding; w: (Dp, Dp) bf16, zero-padded, out = y @ w.
    x = x_ref[...].astype(jnp.float32)

    # LayerNorm over the *real* last dim (eps = 1e-5, torch default).
    inv_d = 1.0 / d_real
    mean = jnp.sum(x, axis=-1, keepdims=True) * inv_d  # padded lanes are 0 -> sum correct
    xc = x - mean
    if d_pad != d_real:
        lane = jax.lax.broadcasted_iota(jnp.int32, xc.shape, 1)
        xc = jnp.where(lane < d_real, xc, 0.0)          # keep variance over real lanes only
    var = jnp.sum(xc * xc, axis=-1, keepdims=True) * inv_d
    inv = jax.lax.rsqrt(var + 1e-5)

    # gamma/beta are zero in padded lanes, so padded lanes of y are exactly 0.
    y = xc * inv * g_ref[...].astype(jnp.float32) + b_ref[...].astype(jnp.float32)

    # fn = Linear(dim, dim): bf16 inputs on the MXU, f32 accumulation.
    out = jnp.dot(y.astype(jnp.bfloat16), w_ref[...],
                  preferred_element_type=jnp.float32)
    out = out + wb_ref[...].astype(jnp.float32)
    o_ref[...] = out.astype(o_ref.dtype)


def prenorm(x, gamma, beta, w, wb, *, tile_tokens=256):
    """x: (B, N, D); gamma/beta: (D,); w: (D, D) [out = y @ w]; wb: (D,)."""
    B, N, D = x.shape
    T = B * N

    # Lane-dense padding: last dim to a multiple of 128, tokens to a multiple of tile.
    Dp = pl.cdiv(D, 128) * 128
    tm = int(tile_tokens)
    Tp = pl.cdiv(T, tm) * tm

    x2 = x.reshape(T, D)
    if Tp != T or Dp != D:
        x2 = jnp.pad(x2, ((0, Tp - T), (0, Dp - D)))
    pad_d = Dp - D
    g2 = jnp.pad(gamma, (0, pad_d)).reshape(1, Dp).astype(jnp.float32)
    b2 = jnp.pad(beta, (0, pad_d)).reshape(1, Dp).astype(jnp.float32)
    wb2 = jnp.pad(wb, (0, pad_d)).reshape(1, Dp).astype(jnp.float32)
    # Weight fed in bf16: halves HBM/VMEM footprint and hits the fast MXU path.
    w2 = jnp.pad(w, ((0, pad_d), (0, pad_d))).astype(jnp.bfloat16)

    # VMEM budget: x/out tiles double-buffered, weight + affine params single-buffered.
    xb = jnp.dtype(x.dtype).itemsize
    needed = (2 * 2 * tm * Dp * xb          # x + out, double-buffered
              + Dp * Dp * 2                 # bf16 weight, single-buffered
              + 3 * Dp * 4)                 # gamma / beta / bias
    vmem_limit = int(min(max(needed + (16 << 20), 32 << 20), 64 << 20))

    kernel = functools.partial(_prenorm_kernel, d_real=D, d_pad=Dp)
    invariant = pl.Buffered(1)  # constant index_map -> no point double-buffering

    out = pl.pallas_call(
        kernel,
        out_shape=jax.ShapeDtypeStruct((Tp, Dp), x.dtype),
        grid_spec=pltpu.PrefetchScalarGridSpec(
            num_scalar_prefetch=0,
            grid=(Tp // tm,),
            in_specs=[
                pl.BlockSpec((tm, Dp), lambda i: (i, 0)),                              # x tile
                pl.BlockSpec((1, Dp), lambda i: (0, 0), pipeline_mode=invariant),      # gamma
                pl.BlockSpec((1, Dp), lambda i: (0, 0), pipeline_mode=invariant),      # beta
                pl.BlockSpec((Dp, Dp), lambda i: (0, 0), pipeline_mode=invariant),     # fn weight
                pl.BlockSpec((1, Dp), lambda i: (0, 0), pipeline_mode=invariant),      # fn bias
            ],
            out_specs=pl.BlockSpec((tm, Dp), lambda i: (i, 0)),
        ),
        compiler_params=pltpu.CompilerParams(
            dimension_semantics=("parallel",),
            vmem_limit_bytes=vmem_limit,
        ),
    )(x2, g2, b2, w2, wb2)

    return out[:T, :D].reshape(B, N, D)


def prenorm_reference(x, gamma, beta, w, wb):
    xf = x.astype(jnp.float32)
    mean = jnp.mean(xf, axis=-1, keepdims=True)
    var = jnp.mean((xf - mean) ** 2, axis=-1, keepdims=True)
    y = (xf - mean) * jax.lax.rsqrt(var + 1e-5) * gamma + beta
    return (y @ w + wb).astype(x.dtype)


if __name__ == "__main__":
    B, N, D = 2, 8, 32  # batch=2, seq=8, hidden dim=32
    key = jax.random.PRNGKey(0)
    kx, kg, kb, kw, kwb = jax.random.split(key, 5)

    x = jax.random.normal(kx, (B, N, D), dtype=jnp.float32)
    # LayerNorm params (torch default init is ones/zeros; perturb for a non-trivial test).
    gamma = 1.0 + 0.1 * jax.random.normal(kg, (D,), dtype=jnp.float32)
    beta = 0.1 * jax.random.normal(kb, (D,), dtype=jnp.float32)
    # fn = Linear(D, D): weight stored as (D, D) so that out = y @ w (== torch y @ W.T).
    w = jax.random.normal(kw, (D, D), dtype=jnp.float32) / jnp.sqrt(D)
    wb = 0.1 * jax.random.normal(kwb, (D,), dtype=jnp.float32)

    out = prenorm(x, gamma, beta, w, wb)
    out = jax.block_until_ready(out)

    ref = prenorm_reference(x, gamma, beta, w, wb)
    assert out.shape == (B, N, D)
    # bf16 MXU inputs (f32 accumulation) -> loosened tolerance vs. the pure-f32 reference.
    assert jnp.allclose(out, ref, atol=5e-2, rtol=5e-2), float(jnp.max(jnp.abs(out - ref)))

    print("KERNEL_OK")
</pallas_src>

<mosaic_0001>
module attributes {stable_mosaic.version = 11 : i64} {
  func.func @_prenorm_kernel(%arg0: i32, %arg1: memref<256x128xf32, #tpu.memory_space<vmem>>, %arg2: memref<1x128xf32, #tpu.memory_space<vmem>>, %arg3: memref<1x128xf32, #tpu.memory_space<vmem>>, %arg4: memref<128x128xbf16, #tpu.memory_space<vmem>>, %arg5: memref<1x128xf32, #tpu.memory_space<vmem>>, %arg6: memref<256x128xf32, #tpu.memory_space<vmem>>) attributes {dimension_semantics = [#tpu.dimension_semantics<parallel>], iteration_bounds = array<i64: 1>, scalar_prefetch = 0 : i64, scratch_operands = 0 : i64, tpu.core_type = #tpu.core_type<tc>, window_params = [{transform_indices = @transform_0, window_bounds = array<i64: 256, 128>}, {pipeline_mode = #tpu.pipeline_mode<synchronous>, transform_indices = @transform_1, window_bounds = array<i64: 1, 128>}, {pipeline_mode = #tpu.pipeline_mode<synchronous>, transform_indices = @transform_2, window_bounds = array<i64: 1, 128>}, {pipeline_mode = #tpu.pipeline_mode<synchronous>, transform_indices = @transform_3, window_bounds = array<i64: 128, 128>}, {pipeline_mode = #tpu.pipeline_mode<synchronous>, transform_indices = @transform_4, window_bounds = array<i64: 1, 128>}, {transform_indices = @transform_5, window_bounds = array<i64: 256, 128>}]} {
    %c0 = arith.constant 0 : index
    %c0_0 = arith.constant 0 : index
    %0 = vector.load %arg1[%c0, %c0_0] : memref<256x128xf32, #tpu.memory_space<vmem>>, vector<256x128xf32>
    %cst = arith.constant dense<0.000000e+00> : vector<256xf32>
    %1 = vector.multi_reduction <add>, %0, %cst [1] : vector<256x128xf32> to vector<256xf32>
    %2 = vector.shape_cast %1 : vector<256xf32> to vector<256x1xf32>
    %cst_1 = arith.constant 3.125000e-02 : f32
    %3 = vector.broadcast %cst_1 : f32 to vector<256x1xf32>
    %4 = arith.mulf %2, %3 : vector<256x1xf32>
    %5 = vector.broadcast %4 : vector<256x1xf32> to vector<256x128xf32>
    %6 = arith.subf %0, %5 : vector<256x128xf32>
    %7 = tpu.iota {dimensions = array<i32: 1>} : vector<256x128xi32>
    %c32_i32 = arith.constant 32 : i32
    %8 = vector.broadcast %c32_i32 : i32 to vector<256x128xi32>
    %9 = arith.cmpi slt, %7, %8 : vector<256x128xi32>
    %cst_2 = arith.constant 0.000000e+00 : f32
    %10 = vector.broadcast %cst_2 : f32 to vector<256x128xf32>
    %11 = arith.select %9, %6, %10 : vector<256x128xi1>, vector<256x128xf32>
    %12 = arith.mulf %11, %11 : vector<256x128xf32>
    %cst_3 = arith.constant dense<0.000000e+00> : vector<256xf32>
    %13 = vector.multi_reduction <add>, %12, %cst_3 [1] : vector<256x128xf32> to vector<256xf32>
    %14 = vector.shape_cast %13 : vector<256xf32> to vector<256x1xf32>
    %cst_4 = arith.constant 3.125000e-02 : f32
    %15 = vector.broadcast %cst_4 : f32 to vector<256x1xf32>
    %16 = arith.mulf %14, %15 : vector<256x1xf32>
    %cst_5 = arith.constant 9.99999974E-6 : f32
    %17 = vector.broadcast %cst_5 : f32 to vector<256x1xf32>
    %18 = arith.addf %16, %17 : vector<256x1xf32>
    %19 = math.rsqrt %18 : vector<256x1xf32>
    %20 = vector.broadcast %19 : vector<256x1xf32> to vector<256x128xf32>
    %21 = arith.mulf %11, %20 : vector<256x128xf32>
    %c0_6 = arith.constant 0 : index
    %c0_7 = arith.constant 0 : index
    %22 = vector.load %arg2[%c0_6, %c0_7] : memref<1x128xf32, #tpu.memory_space<vmem>>, vector<1x128xf32>
    %23 = vector.broadcast %22 : vector<1x128xf32> to vector<256x128xf32>
    %24 = arith.mulf %21, %23 : vector<256x128xf32>
    %c0_8 = arith.constant 0 : index
    %c0_9 = arith.constant 0 : index
    %25 = vector.load %arg3[%c0_8, %c0_9] : memref<1x128xf32, #tpu.memory_space<vmem>>, vector<1x128xf32>
    %26 = vector.broadcast %25 : vector<1x128xf32> to vector<256x128xf32>
    %27 = arith.addf %24, %26 : vector<256x128xf32>
    %28 = arith.truncf %27 : vector<256x128xf32> to vector<256x128xbf16>
    %c0_10 = arith.constant 0 : index
    %c0_11 = arith.constant 0 : index
    %29 = vector.load %arg4[%c0_10, %c0_11] : memref<128x128xbf16, #tpu.memory_space<vmem>>, vector<128x128xbf16>
    %cst_12 = arith.constant dense<0.000000e+00> : vector<256x128xf32>
    %30 = tpu.matmul %28, %29, %cst_12 {dimension_numbers = #tpu.dot_dimension_numbers<[1], [0], [0], [1], [0, 0, 1, 1], [], []>} : vector<256x128xbf16>, vector<128x128xbf16>, vector<256x128xf32> -> vector<256x128xf32>
    %c0_13 = arith.constant 0 : index
    %c0_14 = arith.constant 0 : index
    %31 = vector.load %arg5[%c0_13, %c0_14] : memref<1x128xf32, #tpu.memory_space<vmem>>, vector<1x128xf32>
    %32 = vector.broadcast %31 : vector<1x128xf32> to vector<256x128xf32>
    %33 = arith.addf %30, %32 : vector<256x128xf32>
    %c0_15 = arith.constant 0 : index
    %c0_16 = arith.constant 0 : index
    %34 = vector.load %arg6[%c0_15, %c0_16] : memref<256x128xf32, #tpu.memory_space<vmem>>, vector<256x128xf32>
    tpu.vector_store %arg6[%c0_15, %c0_16], %33 {strides = array<i32>} : memref<256x128xf32, #tpu.memory_space<vmem>>, vector<256x128xf32>,
    return
  }
  func.func @transform_0(%arg0: i32) -> (i32, i32) {
    %c0_i32 = arith.constant 0 : i32
    %c0_i32_0 = arith.constant 0 : i32
    return %arg0, %c0_i32 : i32, i32
  }
  func.func @transform_1(%arg0: i32) -> (i32, i32) {
    %c0_i32 = arith.constant 0 : i32
    %c0_i32_0 = arith.constant 0 : i32
    %c0_i32_1 = arith.constant 0 : i32
    return %c0_i32, %c0_i32_0 : i32, i32
  }
  func.func @transform_2(%arg0: i32) -> (i32, i32) {
    %c0_i32 = arith.constant 0 : i32
    %c0_i32_0 = arith.constant 0 : i32
    %c0_i32_1 = arith.constant 0 : i32
    return %c0_i32, %c0_i32_0 : i32, i32
  }
  func.func @transform_3(%arg0: i32) -> (i32, i32) {
    %c0_i32 = arith.constant 0 : i32
    %c0_i32_0 = arith.constant 0 : i32
    %c0_i32_1 = arith.constant 0 : i32
    return %c0_i32, %c0_i32_0 : i32, i32
  }
  func.func @transform_4(%arg0: i32) -> (i32, i32) {
    %c0_i32 = arith.constant 0 : i32
    %c0_i32_0 = arith.constant 0 : i32
    %c0_i32_1 = arith.constant 0 : i32
    return %c0_i32, %c0_i32_0 : i32, i32
  }
  func.func @transform_5(%arg0: i32) -> (i32, i32) {
    %c0_i32 = arith.constant 0 : i32
    %c0_i32_0 = arith.constant 0 : i32
    return %arg0, %c0_i32 : i32, i32
  }
}

</mosaic_0001>

<bundles_post_ra>
// kernel: tpu_custom_call.1
= control target key start
LH: loop header
LB: loop body
LE: loop exit
PB: predicated region body
PF: predicated region fallthrough
CT: control target
= control target key end

     0   :  { %10 = vsyncpa [#allocation3], 0  ;;  %s1640_s0 = inlined_call_operand.hbm [shape: f32[256,128], index: 0, kind: input, shape index: {}]   ;;  %s1641_s1 = inlined_call_operand.vmem [shape: f32[1,128], index: 1, kind: input, shape index: {}]   ;;  %s1642_s2 = inlined_call_operand.vmem [shape: f32[1,128], index: 2, kind: input, shape index: {}]   ;;  %s1643_s3 = inlined_call_operand.hbm [shape: bf16[128,128], index: 3, kind: input, shape index: {}]   ;;  %s1644_s4 = inlined_call_operand.vmem [shape: f32[1,128], index: 4, kind: input, shape index: {}]   ;;  %s1645_s5 = inlined_call_operand.hbm [shape: f32[256,128], index: 5, kind: output, shape index: {}]  }
   0x1   :  { %11 = vsyncpa [#allocation6], 0 }
   0x2   :  { %12 = vsyncpa [#allocation4], 0  ;;  %s1095_s18 = smov [#allocation2]   ;;  %s1023_s22 = scalar_lea.hbm %s1640_s0, 4096 }
   0x3   :  { %s18_s19 = sshll.u32 %s1095_s18, 4  ;;  %p1024_p0 = scmp.ne.s32.totalorder %s1640_s0, %s1023_s22  ;;  %s19_s19 = int_to_ptr.vmem [resolvable:$true] %s18_s19 }
   0x4   :  { %p1027_p1 = scmp.lt.u32.totalorder %s1023_s22, %s1640_s0 }
   0x6   :  { %p1029_p2 = pnand %p1027_p1, %p1024_p0 }
   0x8   :  { %1032 = shalt.err (!%p1029_p2)
}
   0x9   :  { %s1033_s27 = scalar_lea.vmem %s19_s19, 4096  ;;  %p1038_p4 = scmp.lt.s32.totalorder %s19_s19, %s19_s19 }
   0xa   :  { %p1034_p3 = scmp.ne.s32.totalorder %s19_s19, %s1033_s27  ;;  %p1039_p5 = scmp.lt.s32.totalorder %s1033_s27, %s1033_s27 }
   0xc   :  { %p1040_p6 = por %p1039_p5, %p1038_p4 }
   0xe   :  { %p1041_p7 = pnand %p1040_p6, %p1034_p3 }
  0x10   :  { %1044 = shalt.err (!%p1041_p7)
}
  0x11   :  { %s1096_s28 = smov 128   ;;  %s1097_s29 = smov 8  }
  0x12   :  { %24 = dma.hbm_to_vmem [thread:$0]  %s1640_s0, 4096, %s19_s19, [#allocation3], %s1096_s28, %s1096_s28, %s1097_s29  }
  0x13   :  { %s1098_s7 = smov [#allocation5]   ;;  %s1045_s11 = scalar_lea.hbm %s1643_s3, 1024 }
  0x14   :  { %s34_s8 = sshll.u32 %s1098_s7, 4  ;;  %p1046_p8 = scmp.ne.s32.totalorder %s1643_s3, %s1045_s11  ;;  %s35_s8 = int_to_ptr.vmem [resolvable:$true] %s34_s8 }
  0x15   :  { %p1049_p9 = scmp.lt.u32.totalorder %s1045_s11, %s1643_s3 }
  0x17   :  { %p1051_p10 = pnand %p1049_p9, %p1046_p8 }
  0x19   :  { %1054 = shalt.err (!%p1051_p10)
}
  0x1a   :  { %s1055_s16 = scalar_lea.vmem %s35_s8, 1024  ;;  %p1060_p12 = scmp.lt.s32.totalorder %s35_s8, %s35_s8 }
  0x1b   :  { %p1056_p11 = scmp.ne.s32.totalorder %s35_s8, %s1055_s16  ;;  %p1061_p13 = scmp.lt.s32.totalorder %s1055_s16, %s1055_s16 }
  0x1d   :  { %p1062_p0 = por %p1061_p13, %p1060_p12 }
  0x1f   :  { %p1063_p1 = pnand %p1062_p0, %p1056_p11 }
  0x21   :  { %1066 = shalt.err (!%p1063_p1)
}
  0x22   :  { %s1099_s0 = smov 64   ;;  %s1100_s17 = smov 4  }
  0x23   :  { %40 = dma.hbm_to_vmem [thread:$0]  %s1643_s3, 1024, %s35_s8, [#allocation6], %s1099_s0, %s1099_s0, %s1100_s17  }
  0x24   :  { %1089 = dma.done.wait [#allocation3], 4096  }
  0x25   :  { %1090 = vsyncadd [#allocation3], 4294963200 }
  0x26   :  { %1091 = dma.done.wait [#allocation6], 1024  }
  0x27   :  { %1092 = vsyncadd [#allocation6], 4294966272  ;;  %v1159_v0 = vld [vmem:[#allocation2] sm:$0xff]  ;;  %v1165_v2 = vld [vmem:[#allocation2 + $0x8] sm:$0xff]  ;;  %v210_v32 = vlaneseq }
  0x28   :  { %v1161_v1 = vld [vmem:[#allocation2 + $0x80] sm:$0xff]  ;;  %82 = vadd.xlane.f32.xlu0 %v1159_v0  ;;  %v1167_v3 = vld [vmem:[#allocation2 + $0x88] sm:$0xff]  ;;  %v1171_v4 = vld [vmem:[#allocation2 + $0x10] sm:$0xff] }
  0x29   :  { %114 = vadd.xlane.f32.xlu1 %v1161_v1  ;;  %v1173_v5 = vld [vmem:[#allocation2 + $0x18] sm:$0xff]  ;;  %v1177_v6 = vld [vmem:[#allocation2 + $0x90] sm:$0xff]  ;;  %v1181_v8 = vld [vmem:[#allocation2 + $0x20] sm:$0xff]  ;;  %v1255_v33 = vand.u32 127, %v210_v32 }
  0x2a   :  { %v1179_v7 = vld [vmem:[#allocation2 + $0x98] sm:$0xff]  ;;  %v1183_v9 = vld [vmem:[#allocation2 + $0x28] sm:$0xff]  ;;  %v1189_v10 = vld [vmem:[#allocation2 + $0xa0] sm:$0xff] }
  0x2b   :  { %v1191_v11 = vld [vmem:[#allocation2 + $0xa8] sm:$0xff]  ;;  %v1195_v12 = vld [vmem:[#allocation2 + $0x30] sm:$0xff]  ;;  %v1197_v13 = vld [vmem:[#allocation2 + $0x38] sm:$0xff]  ;;  %vm212_vm0 = vcmp.lt.s32.totalorder %v1255_v33, 32 }
  0x2c   :  { %84 = vadd.xlane.f32.xlu0 %v1165_v2  ;;  %v1201_v14 = vld [vmem:[#allocation2 + $0xb0] sm:$0xff]  ;;  %v1203_v15 = vld [vmem:[#allocation2 + $0xb8] sm:$0xff]  ;;  %v1207_v16 = vld [vmem:[#allocation2 + $0x40] sm:$0xff] }
  0x2d   :  { %116 = vadd.xlane.f32.xlu1 %v1167_v3  ;;  %v1209_v17 = vld [vmem:[#allocation2 + $0x48] sm:$0xff]  ;;  %v1213_v18 = vld [vmem:[#allocation2 + $0xc0] sm:$0xff]  ;;  %v1219_v20 = vld [vmem:[#allocation2 + $0x50] sm:$0xff] }
  0x2e   :  { %v1215_v19 = vld [vmem:[#allocation2 + $0xc8] sm:$0xff]  ;;  %v1221_v21 = vld [vmem:[#allocation2 + $0x58] sm:$0xff]  ;;  %v1225_v22 = vld [vmem:[#allocation2 + $0xd0] sm:$0xff] }
  0x2f   :  { %v1227_v23 = vld [vmem:[#allocation2 + $0xd8] sm:$0xff]  ;;  %v1231_v24 = vld [vmem:[#allocation2 + $0x60] sm:$0xff]  ;;  %v1233_v25 = vld [vmem:[#allocation2 + $0x68] sm:$0xff] }
  0x30   :  { %86 = vadd.xlane.f32.xlu0 %v1171_v4  ;;  %v1237_v26 = vld [vmem:[#allocation2 + $0xe0] sm:$0xff]  ;;  %v1239_v27 = vld [vmem:[#allocation2 + $0xe8] sm:$0xff]  ;;  %v1243_v28 = vld [vmem:[#allocation2 + $0x70] sm:$0xff] }
  0x31   :  { %88 = vadd.xlane.f32.xlu1 %v1173_v5  ;;  %v1245_v29 = vld [vmem:[#allocation2 + $0x78] sm:$0xff]  ;;  %v1249_v30 = vld [vmem:[#allocation2 + $0xf0] sm:$0xff] }
  0x32   :  { %v1251_v31 = vld [vmem:[#allocation2 + $0xf8] sm:$0xff] }
  0x34   :  { %118 = vadd.xlane.f32.xlu0 %v1177_v6 }
  0x35   :  { %120 = vadd.xlane.f32.xlu1 %v1179_v7 }
  0x38   :  { %90 = vadd.xlane.f32.xlu0 %v1181_v8 }
  0x39   :  { %92 = vadd.xlane.f32.xlu1 %v1183_v9 }
  0x3c   :  { %122 = vadd.xlane.f32.xlu0 %v1189_v10 }
  0x3d   :  { %124 = vadd.xlane.f32.xlu1 %v1191_v11 }
  0x40   :  { %94 = vadd.xlane.f32.xlu0 %v1195_v12 }
  0x41   :  { %96 = vadd.xlane.f32.xlu1 %v1197_v13 }
  0x44   :  { %126 = vadd.xlane.f32.xlu0 %v1201_v14 }
  0x45   :  { %128 = vadd.xlane.f32.xlu1 %v1203_v15 }
  0x48   :  { %98 = vadd.xlane.f32.xlu0 %v1207_v16 }
  0x49   :  { %100 = vadd.xlane.f32.xlu1 %v1209_v17 }
  0x4c   :  { %130 = vadd.xlane.f32.xlu0 %v1213_v18 }
  0x4d   :  { %132 = vadd.xlane.f32.xlu1 %v1215_v19 }
  0x50   :  { %102 = vadd.xlane.f32.xlu0 %v1219_v20 }
  0x51   :  { %104 = vadd.xlane.f32.xlu1 %v1221_v21 }
  0x54   :  { %134 = vadd.xlane.f32.xlu0 %v1225_v22 }
  0x55   :  { %136 = vadd.xlane.f32.xlu1 %v1227_v23 }
  0x58   :  { %106 = vadd.xlane.f32.xlu0 %v1231_v24 }
  0x59   :  { %108 = vadd.xlane.f32.xlu1 %v1233_v25 }
  0x5c   :  { %138 = vadd.xlane.f32.xlu0 %v1237_v26 }
  0x5d   :  { %140 = vadd.xlane.f32.xlu1 %v1239_v27 }
  0x60   :  { %110 = vadd.xlane.f32.xlu0 %v1243_v28 }
  0x61   :  { %112 = vadd.xlane.f32.xlu1 %v1245_v29 }
  0x64   :  { %142 = vadd.xlane.f32.xlu0 %v1249_v30 }
  0x65   :  { %144 = vadd.xlane.f32.xlu1 %v1251_v31 }
  0xb5   :  { %v83_v34 = vpop.xlane.xlu0 %82 }
  0xb6   :  { %v115_v35 = vpop.xlane.xlu1 %114  ;;  %v146_v36 = vmul.f32 0.03125, %v83_v34 }
  0xb7   :  { %v162_v37 = vmul.f32 0.03125, %v115_v35 }
  0xb8   :  { %v178_v38 = vsub.f32 %v1159_v0, %v146_v36 }
  0xb9   :  { %v194_v39 = vsub.f32 %v1161_v1, %v162_v37  ;;  %v85_v40 = vpop.xlane.xlu0 %84 }
  0xba   :  { %v117_v41 = vpop.xlane.xlu1 %116  ;;  %v147_v42 = vmul.f32 0.03125, %v85_v40  ;;  %v1262_v44 = vsel %vm212_vm0, %v178_v38, 0.0 }
  0xbb   :  { %v163_v43 = vmul.f32 0.03125, %v117_v41  ;;  %v1266_v45 = vsel %vm212_vm0, %v194_v39, 0.0  ;;  %v245_v46 = vmul.f32 %v1262_v44, %v1262_v44 }
  0xbc   :  { %v179_v47 = vsub.f32 %v1165_v2, %v147_v42  ;;  %v261_v51 = vmul.f32 %v1266_v45, %v1266_v45 }
  0xbd   :  { %v195_v48 = vsub.f32 %v1167_v3, %v163_v43  ;;  %277 = vadd.xlane.f32.xlu0 %v245_v46  ;;  %v87_v49 = vpop.xlane.xlu0 %86 }
  0xbe   :  { %v89_v50 = vpop.xlane.xlu1 %88  ;;  %v148_v52 = vmul.f32 0.03125, %v87_v49  ;;  %v1276_v54 = vsel %vm212_vm0, %v179_v47, 0.0 }
  0xbf   :  { %v149_v53 = vmul.f32 0.03125, %v89_v50  ;;  %v1280_v55 = vsel %vm212_vm0, %v195_v48, 0.0  ;;  %v246_v56 = vmul.f32 %v1276_v54, %v1276_v54  ;;  %v951_v50 = vld [vmem:[#allocation5] sm:$0xff]  }
  0xc0   :  { %v180_v57 = vsub.f32 %v1171_v4, %v148_v52  ;;  %v262_v61 = vmul.f32 %v1280_v55, %v1280_v55  ;;  %880 = vmatprep.subr.bf16.mxu0 %v951_v50  ;;  %928 = vmatprep.subr.bf16.mxu1 %v951_v50 }
  0xc1   :  { %v181_v58 = vsub.f32 %v1173_v5, %v149_v53  ;;  %309 = vadd.xlane.f32.xlu0 %v261_v51  ;;  %279 = vadd.xlane.f32.xlu1 %v246_v56  ;;  %v119_v59 = vpop.xlane.xlu0 %118 }
  0xc2   :  { %v121_v60 = vpop.xlane.xlu1 %120  ;;  %v164_v62 = vmul.f32 0.03125, %v119_v59  ;;  %v1290_v0 = vsel %vm212_vm0, %v180_v57, 0.0  ;;  %881 = vmatpush3.bf16.msra.mxu0 %v951_v50  ;;  %936 = vmatpush3.bf16.msra.mxu1 %v951_v50 }
  0xc3   :  { %v165_v63 = vmul.f32 0.03125, %v121_v60  ;;  %v1294_v1 = vsel %vm212_vm0, %v181_v58, 0.0  ;;  %v247_v2 = vmul.f32 %v1290_v0, %v1290_v0 }
  0xc4   :  { %v196_v3 = vsub.f32 %v1177_v6, %v164_v62  ;;  %v248_v34 = vmul.f32 %v1294_v1, %v1294_v1 }
  0xc5   :  { %v197_v4 = vsub.f32 %v1179_v7, %v165_v63  ;;  %311 = vadd.xlane.f32.xlu1 %v262_v61  ;;  %281 = vadd.xlane.f32.xlu0 %v247_v2  ;;  %v91_v5 = vpop.xlane.xlu0 %90  ;;  %v952_v2 = vld [vmem:[#allocation5 + $0x8] sm:$0xff]  }
  0xc6   :  { %v93_v32 = vpop.xlane.xlu1 %92  ;;  %v150_v35 = vmul.f32 0.03125, %v91_v5  ;;  %v1304_v37 = vsel %vm212_vm0, %v196_v3, 0.0  ;;  %882 = vmatprep.subr.bf16.mxu0 %v952_v2  ;;  %929 = vmatprep.subr.bf16.mxu1 %v952_v2 }
  0xc7   :  { %v151_v36 = vmul.f32 0.03125, %v93_v32  ;;  %v1308_v38 = vsel %vm212_vm0, %v197_v4, 0.0  ;;  %v263_v6 = vmul.f32 %v1304_v37, %v1304_v37  ;;  %883 = vmatpush3.bf16.msra.mxu0 %v952_v2  ;;  %937 = vmatpush3.bf16.msra.mxu1 %v952_v2 }
  0xc8   :  { %v182_v7 = vsub.f32 %v1181_v8, %v150_v35  ;;  %v264_v42 = vmul.f32 %v1308_v38, %v1308_v38 }
  0xc9   :  { %v183_v39 = vsub.f32 %v1183_v9, %v151_v36  ;;  %283 = vadd.xlane.f32.xlu1 %v248_v34  ;;  %313 = vadd.xlane.f32.xlu0 %v263_v6  ;;  %v123_v40 = vpop.xlane.xlu0 %122 }
  0xca   :  { %v125_v41 = vpop.xlane.xlu1 %124  ;;  %v166_v43 = vmul.f32 0.03125, %v123_v40  ;;  %v1318_v47 = vsel %vm212_vm0, %v182_v7, 0.0  ;;  %v953_v7 = vld [vmem:[#allocation5 + $0x10] sm:$0xff]  }
  0xcb   :  { %v167_v46 = vmul.f32 0.03125, %v125_v41  ;;  %v1322_v48 = vsel %vm212_vm0, %v183_v39, 0.0  ;;  %v249_v8 = vmul.f32 %v1318_v47, %v1318_v47  ;;  %884 = vmatprep.subr.bf16.mxu0 %v953_v7  ;;  %930 = vmatprep.subr.bf16.mxu1 %v953_v7 }
  0xcc   :  { %v198_v9 = vsub.f32 %v1189_v10, %v166_v43  ;;  %v250_v53 = vmul.f32 %v1322_v48, %v1322_v48  ;;  %885 = vmatpush3.bf16.msra.mxu0 %v953_v7  ;;  %938 = vmatpush3.bf16.msra.mxu1 %v953_v7 }
  0xcd   :  { %v199_v49 = vsub.f32 %v1191_v11, %v167_v46  ;;  %315 = vadd.xlane.f32.xlu1 %v264_v42  ;;  %285 = vadd.xlane.f32.xlu0 %v249_v8  ;;  %v95_v51 = vpop.xlane.xlu0 %94 }
  0xce   :  { %v97_v52 = vpop.xlane.xlu1 %96  ;;  %v152_v56 = vmul.f32 0.03125, %v95_v51  ;;  %v1332_v58 = vsel %vm212_vm0, %v198_v9, 0.0 }
  0xcf   :  { %v153_v57 = vmul.f32 0.03125, %v97_v52  ;;  %v1336_v59 = vsel %vm212_vm0, %v199_v49, 0.0  ;;  %v265_v10 = vmul.f32 %v1332_v58, %v1332_v58  ;;  %v954_v49 = vld [vmem:[#allocation5 + $0x18] sm:$0xff]  }
  0xd0   :  { %v184_v11 = vsub.f32 %v1195_v12, %v152_v56  ;;  %v266_v63 = vmul.f32 %v1336_v59, %v1336_v59  ;;  %886 = vmatprep.subr.bf16.mxu0 %v954_v49  ;;  %931 = vmatprep.subr.bf16.mxu1 %v954_v49 }
  0xd1   :  { %v185_v60 = vsub.f32 %v1197_v13, %v153_v57  ;;  %287 = vadd.xlane.f32.xlu1 %v250_v53  ;;  %317 = vadd.xlane.f32.xlu0 %v265_v10  ;;  %v127_v61 = vpop.xlane.xlu0 %126 }
  0xd2   :  { %v129_v62 = vpop.xlane.xlu1 %128  ;;  %v168_v3 = vmul.f32 0.03125, %v127_v61  ;;  %v1346_v5 = vsel %vm212_vm0, %v184_v11, 0.0  ;;  %887 = vmatpush3.bf16.msra.mxu0 %v954_v49  ;;  %939 = vmatpush3.bf16.msra.mxu1 %v954_v49 }
  0xd3   :  { %v169_v4 = vmul.f32 0.03125, %v129_v62  ;;  %v1350_v32 = vsel %vm212_vm0, %v185_v60, 0.0  ;;  %v251_v12 = vmul.f32 %v1346_v5, %v1346_v5  ;;  %v955_v60 = vld [vmem:[#allocation5 + $0x20] sm:$0xff]  }
  0xd4   :  { %v200_v13 = vsub.f32 %v1201_v14, %v168_v3  ;;  %v252_v6 = vmul.f32 %v1350_v32, %v1350_v32  ;;  %888 = vmatprep.subr.bf16.mxu0 %v955_v60  ;;  %932 = vmatprep.subr.bf16.mxu1 %v955_v60 }
  0xd5   :  { %v201_v34 = vsub.f32 %v1203_v15, %v169_v4  ;;  %319 = vadd.xlane.f32.xlu1 %v266_v63  ;;  %289 = vadd.xlane.f32.xlu0 %v251_v12  ;;  %v99_v35 = vpop.xlane.xlu0 %98 }
  0xd6   :  { %v101_v36 = vpop.xlane.xlu1 %100  ;;  %v154_v39 = vmul.f32 0.03125, %v99_v35  ;;  %v1360_v41 = vsel %vm212_vm0, %v200_v13, 0.0  ;;  %889 = vmatpush3.bf16.msra.mxu0 %v955_v60  ;;  %940 = vmatpush3.bf16.msra.mxu1 %v955_v60 }
  0xd7   :  { %v155_v40 = vmul.f32 0.03125, %v101_v36  ;;  %v1364_v14 = vsel %vm212_vm0, %v201_v34, 0.0  ;;  %v267_v15 = vmul.f32 %v1360_v41, %v1360_v41  ;;  %v956_v34 = vld [vmem:[#allocation5 + $0x28] sm:$0xff]  }
  0xd8   :  { %v186_v42 = vsub.f32 %v1207_v16, %v154_v39  ;;  %v268_v9 = vmul.f32 %v1364_v14, %v1364_v14  ;;  %890 = vmatprep.subr.bf16.mxu0 %v956_v34  ;;  %933 = vmatprep.subr.bf16.mxu1 %v956_v34 }
  0xd9   :  { %v187_v43 = vsub.f32 %v1209_v17, %v155_v40  ;;  %291 = vadd.xlane.f32.xlu1 %v252_v6  ;;  %321 = vadd.xlane.f32.xlu0 %v267_v15  ;;  %v131_v46 = vpop.xlane.xlu0 %130 }
  0xda   :  { %v133_v8 = vpop.xlane.xlu1 %132  ;;  %v170_v50 = vmul.f32 0.03125, %v131_v46  ;;  %v1374_v52 = vsel %vm212_vm0, %v186_v42, 0.0  ;;  %891 = vmatpush3.bf16.msra.mxu0 %v956_v34  ;;  %941 = vmatpush3.bf16.msra.mxu1 %v956_v34 }
  0xdb   :  { %v171_v51 = vmul.f32 0.03125, %v133_v8  ;;  %v1378_v16 = vsel %vm212_vm0, %v187_v43, 0.0  ;;  %v253_v17 = vmul.f32 %v1374_v52, %v1374_v52  ;;  %v957_v43 = vld [vmem:[#allocation5 + $0x30] sm:$0xff]  }
  0xdc   :  { %v202_v53 = vsub.f32 %v1213_v18, %v170_v50  ;;  %v254_v11 = vmul.f32 %v1378_v16, %v1378_v16  ;;  %892 = vmatprep.subr.bf16.mxu0 %v957_v43  ;;  %934 = vmatprep.subr.bf16.mxu1 %v957_v43 }
  0xdd   :  { %v203_v56 = vsub.f32 %v1215_v19, %v171_v51  ;;  %323 = vadd.xlane.f32.xlu1 %v268_v9  ;;  %293 = vadd.xlane.f32.xlu0 %v253_v17  ;;  %v103_v57 = vpop.xlane.xlu0 %102 }
  0xde   :  { %v105_v10 = vpop.xlane.xlu1 %104  ;;  %v156_v61 = vmul.f32 0.03125, %v103_v57  ;;  %v1388_v63 = vsel %vm212_vm0, %v202_v53, 0.0  ;;  %893 = vmatpush3.bf16.msra.mxu0 %v957_v43  ;;  %942 = vmatpush3.bf16.msra.mxu1 %v957_v43 }
  0xdf   :  { %v157_v62 = vmul.f32 0.03125, %v105_v10  ;;  %v1392_v18 = vsel %vm212_vm0, %v203_v56, 0.0  ;;  %v269_v19 = vmul.f32 %v1388_v63, %v1388_v63  ;;  %v958_v56 = vld [vmem:[#allocation5 + $0x38] sm:$0xff]  }
  0xe0   :  { %v188_v2 = vsub.f32 %v1219_v20, %v156_v61  ;;  %v270_v13 = vmul.f32 %v1392_v18, %v1392_v18  ;;  %894 = vmatprep.subr.bf16.mxu0 %v958_v56  ;;  %935 = vmatprep.subr.bf16.mxu1 %v958_v56 }
  0xe1   :  { %v189_v3 = vsub.f32 %v1221_v21, %v157_v62  ;;  %295 = vadd.xlane.f32.xlu1 %v254_v11  ;;  %325 = vadd.xlane.f32.xlu0 %v269_v19  ;;  %v135_v4 = vpop.xlane.xlu0 %134 }
  0xe2   :  { %v137_v12 = vpop.xlane.xlu1 %136  ;;  %v172_v35 = vmul.f32 0.03125, %v135_v4  ;;  %v1402_v6 = vsel %vm212_vm0, %v188_v2, 0.0  ;;  %895 = vmatpush3.bf16.msra.mxu0 %v958_v56  ;;  %943 = vmatpush3.bf16.msra.mxu1 %v958_v56 }
  0xe3   :  { %v173_v36 = vmul.f32 0.03125, %v137_v12  ;;  %v1406_v20 = vsel %vm212_vm0, %v189_v3, 0.0  ;;  %v255_v21 = vmul.f32 %v1402_v6, %v1402_v6 }
  0xe4   :  { %v204_v7 = vsub.f32 %v1225_v22, %v172_v35  ;;  %v256_v42 = vmul.f32 %v1406_v20, %v1406_v20 }
  0xe5   :  { %v205_v39 = vsub.f32 %v1227_v23, %v173_v36  ;;  %327 = vadd.xlane.f32.xlu1 %v270_v13  ;;  %297 = vadd.xlane.f32.xlu0 %v255_v21  ;;  %v107_v40 = vpop.xlane.xlu0 %106 }
  0xe6   :  { %v109_v15 = vpop.xlane.xlu1 %108  ;;  %v158_v46 = vmul.f32 0.03125, %v107_v40  ;;  %v1416_v9 = vsel %vm212_vm0, %v204_v7, 0.0 }
  0xe7   :  { %v159_v8 = vmul.f32 0.03125, %v109_v15  ;;  %v1420_v22 = vsel %vm212_vm0, %v205_v39, 0.0  ;;  %v271_v23 = vmul.f32 %v1416_v9, %v1416_v9 }
  0xe8   :  { %v190_v49 = vsub.f32 %v1231_v24, %v158_v46  ;;  %v272_v53 = vmul.f32 %v1420_v22, %v1420_v22 }
  0xe9   :  { %v191_v50 = vsub.f32 %v1233_v25, %v159_v8  ;;  %299 = vadd.xlane.f32.xlu1 %v256_v42  ;;  %329 = vadd.xlane.f32.xlu0 %v271_v23  ;;  %v139_v51 = vpop.xlane.xlu0 %138 }
  0xea   :  { %v141_v17 = vpop.xlane.xlu1 %140  ;;  %v174_v57 = vmul.f32 0.03125, %v139_v51  ;;  %v1430_v11 = vsel %vm212_vm0, %v190_v49, 0.0 }
  0xeb   :  { %v175_v10 = vmul.f32 0.03125, %v141_v17  ;;  %v1434_v24 = vsel %vm212_vm0, %v191_v50, 0.0  ;;  %v257_v25 = vmul.f32 %v1430_v11, %v1430_v11 }
  0xec   :  { %v206_v60 = vsub.f32 %v1237_v26, %v174_v57  ;;  %v258_v2 = vmul.f32 %v1434_v24, %v1434_v24 }
  0xed   :  { %v207_v61 = vsub.f32 %v1239_v27, %v175_v10  ;;  %331 = vadd.xlane.f32.xlu1 %v272_v53  ;;  %301 = vadd.xlane.f32.xlu0 %v257_v25  ;;  %v111_v62 = vpop.xlane.xlu0 %110 }
  0xee   :  { %v113_v19 = vpop.xlane.xlu1 %112  ;;  %v160_v3 = vmul.f32 0.03125, %v111_v62  ;;  %v1444_v12 = vsel %vm212_vm0, %v206_v60, 0.0 }
  0xef   :  { %v161_v4 = vmul.f32 0.03125, %v113_v19  ;;  %v1448_v26 = vsel %vm212_vm0, %v207_v61, 0.0  ;;  %v273_v27 = vmul.f32 %v1444_v12, %v1444_v12 }
  0xf0   :  { %v192_v13 = vsub.f32 %v1243_v28, %v160_v3  ;;  %v274_v21 = vmul.f32 %v1448_v26, %v1448_v26 }
  0xf1   :  { %v193_v34 = vsub.f32 %v1245_v29, %v161_v4  ;;  %303 = vadd.xlane.f32.xlu1 %v258_v2  ;;  %333 = vadd.xlane.f32.xlu0 %v273_v27  ;;  %v143_v35 = vpop.xlane.xlu0 %142 }
  0xf2   :  { %v145_v36 = vpop.xlane.xlu1 %144  ;;  %v176_v7 = vmul.f32 0.03125, %v143_v35  ;;  %v1458_v40 = vsel %vm212_vm0, %v192_v13, 0.0 }
  0xf3   :  { %v177_v39 = vmul.f32 0.03125, %v145_v36  ;;  %v1462_v15 = vsel %vm212_vm0, %v193_v34, 0.0  ;;  %v259_v28 = vmul.f32 %v1458_v40, %v1458_v40 }
  0xf4   :  { %v208_v29 = vsub.f32 %v1249_v30, %v176_v7  ;;  %v260_v43 = vmul.f32 %v1462_v15, %v1462_v15 }
  0xf5   :  { %v209_v42 = vsub.f32 %v1251_v31, %v177_v39  ;;  %335 = vadd.xlane.f32.xlu1 %v274_v21  ;;  %305 = vadd.xlane.f32.xlu0 %v259_v28 }
  0xf6   :  { %v1472_v46 = vsel %vm212_vm0, %v208_v29, 0.0  ;;  %v1486_v29 = vld [vmem:[%s1641_s1] ss:$0 sm:$0xff] }
  0xf7   :  { %v1476_v8 = vsel %vm212_vm0, %v209_v42, 0.0  ;;  %v275_v23 = vmul.f32 %v1472_v46, %v1472_v46 }
  0xf8   :  { %v276_v30 = vmul.f32 %v1476_v8, %v1476_v8 }
  0xf9   :  { %307 = vadd.xlane.f32.xlu1 %v260_v43  ;;  %337 = vadd.xlane.f32.xlu0 %v275_v23 }
  0xfd   :  { %339 = vadd.xlane.f32.xlu1 %v276_v30 }
 0x14a   :  { %v278_v31 = vpop.xlane.xlu0 %277 }
 0x14b   :  { %v341_v49 = vmul.f32 0.03125, %v278_v31 }
 0x14d   :  { %v373_v50 = vadd.f32 1e-05, %v341_v49 }
 0x14e   :  { %v280_v51 = vpop.xlane.xlu1 %279  ;;  %v310_v17 = vpop.xlane.xlu0 %309 }
 0x14f   :  { %959 = vrsqrt.f32 %v373_v50  ;;  %v342_v53 = vmul.f32 0.03125, %v280_v51  ;;  %v357_v56 = vmul.f32 0.03125, %v310_v17 }
 0x151   :  { %v374_v33 = vadd.f32 1e-05, %v342_v53  ;;  %v389_v57 = vadd.f32 1e-05, %v357_v56  ;;  %v1493_v53 = vld [vmem:[%s1642_s2] ss:$0 sm:$0xff] }
 0x152   :  { %v312_v10 = vpop.xlane.xlu1 %311  ;;  %v282_v25 = vpop.xlane.xlu0 %281 }
 0x153   :  { %961 = vrsqrt.f32 %v374_v33  ;;  %v358_v60 = vmul.f32 0.03125, %v312_v10  ;;  %v343_v61 = vmul.f32 0.03125, %v282_v25 }
 0x154   :  { %963 = vrsqrt.f32 %v389_v57 }
 0x155   :  { %v390_v62 = vadd.f32 1e-05, %v358_v60  ;;  %v375_v19 = vadd.f32 1e-05, %v343_v61 }
 0x156   :  { %v284_v2 = vpop.xlane.xlu1 %283  ;;  %v314_v3 = vpop.xlane.xlu0 %313 }
 0x157   :  { %965 = vrsqrt.f32 %v390_v62  ;;  %v344_v4 = vmul.f32 0.03125, %v284_v2  ;;  %v359_v27 = vmul.f32 0.03125, %v314_v3 }
 0x158   :  { %967 = vrsqrt.f32 %v375_v19 }
 0x159   :  { %v960_v13 = vpop.eup %959  ;;  %v376_v34 = vadd.f32 1e-05, %v344_v4  ;;  %v391_v35 = vadd.f32 1e-05, %v359_v27 }
 0x15a   :  { %v316_v36 = vpop.xlane.xlu1 %315  ;;  %v286_v21 = vpop.xlane.xlu0 %285  ;;  %v437_v7 = vmul.f32 %v960_v13, %v1262_v44 }
 0x15b   :  { %969 = vrsqrt.f32 %v376_v34  ;;  %v360_v39 = vmul.f32 0.03125, %v316_v36  ;;  %v345_v28 = vmul.f32 0.03125, %v286_v21 }
 0x15c   :  { %971 = vrsqrt.f32 %v391_v35  ;;  %v476_v51 = vmul.f32 %v1486_v29, %v437_v7 }
 0x15d   :  { %v962_v42 = vpop.eup %961  ;;  %v392_v43 = vadd.f32 1e-05, %v360_v39  ;;  %v377_v23 = vadd.f32 1e-05, %v345_v28 }
 0x15e   :  { %v964_v30 = vpop.eup %963  ;;  %v288_v31 = vpop.xlane.xlu1 %287  ;;  %v438_v50 = vmul.f32 %v962_v42, %v1276_v54  ;;  %v515_v62 = vadd.f32 %v1493_v53, %v476_v51 }
 0x15f   :  { %v318_v49 = vpop.xlane.xlu0 %317  ;;  %973 = vrsqrt.f32 %v392_v43  ;;  %v346_v44 = vmul.f32 0.03125, %v288_v31  ;;  %v453_v56 = vmul.f32 %v964_v30, %v1266_v45 }
 0x160   :  { %v361_v17 = vmul.f32 0.03125, %v318_v49  ;;  %975 = vrsqrt.f32 %v377_v23  ;;  %v477_v33 = vmul.f32 %v1486_v29, %v438_v50 }
 0x161   :  { %v966_v57 = vpop.eup %965  ;;  %v378_v10 = vadd.f32 1e-05, %v346_v44  ;;  %v492_v3 = vmul.f32 %v1486_v29, %v453_v56 }
 0x162   :  { %v393_v25 = vadd.f32 1e-05, %v361_v17  ;;  %v968_v60 = vpop.eup %967  ;;  %v320_v54 = vpop.xlane.xlu1 %319  ;;  %v516_v19 = vadd.f32 %v1493_v53, %v477_v33  ;;  %v454_v2 = vmul.f32 %v966_v57, %v1280_v55 }
 0x163   :  { %v290_v61 = vpop.xlane.xlu0 %289  ;;  %977 = vrsqrt.f32 %v378_v10  ;;  %v362_v4 = vmul.f32 0.03125, %v320_v54  ;;  %v439_v34 = vmul.f32 %v968_v60, %v1290_v0  ;;  %v531_v55 = vadd.f32 %v1493_v53, %v492_v3 }
 0x164   :  { %v347_v45 = vmul.f32 0.03125, %v290_v61  ;;  %979 = vrsqrt.f32 %v393_v25  ;;  %v547_v27 = vpack.c.bf16 %v516_v19, %v515_v62  ;;  %v493_v13 = vmul.f32 %v1486_v29, %v454_v2 }
 0x165   :  { %v970_v35 = vpop.eup %969  ;;  %v394_v36 = vadd.f32 1e-05, %v362_v4  ;;  %v478_v23 = vmul.f32 %v1486_v29, %v439_v34 }
 0x166   :  { %v379_v21 = vadd.f32 1e-05, %v347_v45  ;;  %v972_v7 = vpop.eup %971  ;;  %v292_v39 = vpop.xlane.xlu1 %291  ;;  %896 = vmatprep.mubr.bf16.mxu0 %v547_v27  ;;  %v532_v42 = vadd.f32 %v1493_v53, %v493_v13  ;;  %v440_v43 = vmul.f32 %v970_v35, %v1294_v1 }
 0x167   :  { %v322_v28 = vpop.xlane.xlu0 %321  ;;  %981 = vrsqrt.f32 %v394_v36  ;;  %v348_v30 = vmul.f32 0.03125, %v292_v39  ;;  %v455_v0 = vmul.f32 %v972_v7, %v1304_v37  ;;  %v517_v1 = vadd.f32 %v1493_v53, %v478_v23 }
 0x168   :  { %v363_v31 = vmul.f32 0.03125, %v322_v28  ;;  %983 = vrsqrt.f32 %v379_v21  ;;  %v555_v49 = vpack.c.bf16 %v532_v42, %v531_v55  ;;  %v479_v50 = vmul.f32 %v1486_v29, %v440_v43 }
 0x169   :  { %v974_v51 = vpop.eup %973  ;;  %v380_v44 = vadd.f32 1e-05, %v348_v30  ;;  %v494_v60 = vmul.f32 %v1486_v29, %v455_v0 }
 0x16a   :  { %v395_v17 = vadd.f32 1e-05, %v363_v31  ;;  %v976_v56 = vpop.eup %975  ;;  %v324_v33 = vpop.xlane.xlu1 %323  ;;  %912 = vmatprep.mubr.bf16.mxu1 %v555_v49  ;;  %v518_v10 = vadd.f32 %v1493_v53, %v479_v50  ;;  %v456_v25 = vmul.f32 %v974_v51, %v1308_v38 }
 0x16b   :  { %v294_v57 = vpop.xlane.xlu0 %293  ;;  %985 = vrsqrt.f32 %v380_v44  ;;  %v364_v37 = vmul.f32 0.03125, %v324_v33  ;;  %v441_v19 = vmul.f32 %v976_v56, %v1318_v47  ;;  %v533_v38 = vadd.f32 %v1493_v53, %v494_v60 }
 0x16c   :  { %v349_v54 = vmul.f32 0.03125, %v294_v57  ;;  %987 = vrsqrt.f32 %v395_v17  ;;  %v548_v61 = vpack.c.bf16 %v518_v10, %v517_v1  ;;  %v495_v62 = vmul.f32 %v1486_v29, %v456_v25 }
 0x16d   :  { %v978_v2 = vpop.eup %977  ;;  %v396_v3 = vadd.f32 1e-05, %v364_v37  ;;  %v480_v36 = vmul.f32 %v1486_v29, %v441_v19 }
 0x16e   :  { %v381_v4 = vadd.f32 1e-05, %v349_v54  ;;  %v980_v45 = vpop.eup %979  ;;  %v296_v27 = vpop.xlane.xlu1 %295  ;;  %897 = vmatmul.mubr.bf16.vlgmr.msra.gmra.mrb[0].mxu0 %v548_v61  ;;  %v534_v34 = vadd.f32 %v1493_v53, %v495_v62  ;;  %v442_v35 = vmul.f32 %v978_v2, %v1322_v48 }
 0x16f   :  { %v326_v13 = vpop.xlane.xlu0 %325  ;;  %989 = vrsqrt.f32 %v396_v3  ;;  %v350_v21 = vmul.f32 0.03125, %v296_v27  ;;  %v457_v47 = vmul.f32 %v980_v45, %v1332_v58  ;;  %v519_v48 = vadd.f32 %v1493_v53, %v480_v36 }
 0x170   :  { %v365_v7 = vmul.f32 0.03125, %v326_v13  ;;  %991 = vrsqrt.f32 %v381_v4  ;;  %v556_v39 = vpack.c.bf16 %v534_v34, %v533_v38  ;;  %v481_v28 = vmul.f32 %v1486_v29, %v442_v35 }
 0x171   :  { %v982_v55 = vpop.eup %981  ;;  %v382_v42 = vadd.f32 1e-05, %v350_v21  ;;  %v496_v50 = vmul.f32 %v1486_v29, %v457_v47 }
 0x172   :  { %v397_v43 = vadd.f32 1e-05, %v365_v7  ;;  %v984_v23 = vpop.eup %983  ;;  %v328_v30 = vpop.xlane.xlu1 %327  ;;  %913 = vmatmul.mubr.bf16.vlgmr.msra.gmra.mrb[0].mxu1 %v556_v39  ;;  %v520_v0 = vadd.f32 %v1493_v53, %v481_v28  ;;  %v458_v49 = vmul.f32 %v982_v55, %v1336_v59 }
 0x173   :  { %v298_v31 = vpop.xlane.xlu0 %297  ;;  %993 = vrsqrt.f32 %v382_v42  ;;  %v366_v58 = vmul.f32 0.03125, %v328_v30  ;;  %v443_v56 = vmul.f32 %v984_v23, %v1346_v5  ;;  %v535_v59 = vadd.f32 %v1493_v53, %v496_v50 }
 0x174   :  { %v351_v51 = vmul.f32 0.03125, %v298_v31  ;;  %995 = vrsqrt.f32 %v397_v43  ;;  %v549_v44 = vpack.c.bf16 %v520_v0, %v519_v48  ;;  %v497_v17 = vmul.f32 %v1486_v29, %v458_v49 }
 0x175   :  { %v986_v33 = vpop.eup %985  ;;  %v398_v57 = vadd.f32 1e-05, %v366_v58  ;;  %v482_v61 = vmul.f32 %v1486_v29, %v443_v56 }
 0x176   :  { %v383_v1 = vadd.f32 1e-05, %v351_v51  ;;  %v988_v10 = vpop.eup %987  ;;  %v300_v25 = vpop.xlane.xlu1 %299  ;;  %900 = vmatprep.mubr.bf16.mxu0 %v549_v44  ;;  %v536_v37 = vadd.f32 %v1493_v53, %v497_v17  ;;  %v444_v54 = vmul.f32 %v986_v33, %v1350_v32 }
 0x177   :  { %v330_v60 = vpop.xlane.xlu0 %329  ;;  %997 = vrsqrt.f32 %v398_v57  ;;  %v352_v62 = vmul.f32 0.03125, %v300_v25  ;;  %v459_v5 = vmul.f32 %v988_v10, %v1360_v41  ;;  %v521_v32 = vadd.f32 %v1493_v53, %v482_v61 }
 0x178   :  { %v367_v19 = vmul.f32 0.03125, %v330_v60  ;;  %999 = vrsqrt.f32 %v383_v1  ;;  %v557_v2 = vpack.c.bf16 %v536_v37, %v535_v59  ;;  %v483_v3 = vmul.f32 %v1486_v29, %v444_v54 }
 0x179   :  { %v990_v4 = vpop.eup %989  ;;  %v384_v45 = vadd.f32 1e-05, %v352_v62  ;;  %v498_v21 = vmul.f32 %v1486_v29, %v459_v5 }
 0x17a   :  { %v399_v27 = vadd.f32 1e-05, %v367_v19  ;;  %v992_v13 = vpop.eup %991  ;;  %v332_v38 = vpop.xlane.xlu1 %331  ;;  %916 = vmatprep.mubr.bf16.mxu1 %v557_v2  ;;  %v522_v35 = vadd.f32 %v1493_v53, %v483_v3  ;;  %v460_v36 = vmul.f32 %v990_v4, %v1364_v14 }
 0x17b   :  { %v302_v34 = vpop.xlane.xlu0 %301  ;;  %1001 = vrsqrt.f32 %v384_v45  ;;  %v368_v41 = vmul.f32 0.03125, %v332_v38  ;;  %v445_v28 = vmul.f32 %v992_v13, %v1374_v52  ;;  %v537_v14 = vadd.f32 %v1493_v53, %v498_v21 }
 0x17c   :  { %v353_v7 = vmul.f32 0.03125, %v302_v34  ;;  %1003 = vrsqrt.f32 %v399_v27  ;;  %v550_v47 = vpack.c.bf16 %v522_v35, %v521_v32  ;;  %v499_v39 = vmul.f32 %v1486_v29, %v460_v36 }
 0x17d   :  { %v994_v55 = vpop.eup %993  ;;  %v400_v42 = vadd.f32 1e-05, %v368_v41  ;;  %v484_v49 = vmul.f32 %v1486_v29, %v445_v28 }
 0x17e   :  { %v385_v43 = vadd.f32 1e-05, %v353_v7  ;;  %v996_v23 = vpop.eup %995  ;;  %v304_v30 = vpop.xlane.xlu1 %303  ;;  %901 = vmatmul.mubr.bf16.gmra.mrb[4].mxu0 %v550_v47  ;;  %v538_v48 = vadd.f32 %v1493_v53, %v499_v39  ;;  %v446_v0 = vmul.f32 %v994_v55, %v1378_v16 }
 0x17f   :  { %v334_v31 = vpop.xlane.xlu0 %333  ;;  %1005 = vrsqrt.f32 %v400_v42  ;;  %v354_v50 = vmul.f32 0.03125, %v304_v30  ;;  %v461_v52 = vmul.f32 %v996_v23, %v1388_v63  ;;  %v523_v16 = vadd.f32 %v1493_v53, %v484_v49 }
 0x180   :  { %v369_v58 = vmul.f32 0.03125, %v334_v31  ;;  %1007 = vrsqrt.f32 %v385_v43  ;;  %v558_v51 = vpack.c.bf16 %v538_v48, %v537_v14  ;;  %v485_v44 = vmul.f32 %v1486_v29, %v446_v0 }
 0x181   :  { %v998_v17 = vpop.eup %997  ;;  %v386_v56 = vadd.f32 1e-05, %v354_v50  ;;  %v500_v59 = vmul.f32 %v1486_v29, %v461_v52 }
 0x182   :  { %v401_v33 = vadd.f32 1e-05, %v369_v58  ;;  %v1000_v57 = vpop.eup %999  ;;  %v336_v1 = vpop.xlane.xlu1 %335  ;;  %917 = vmatmul.mubr.bf16.gmra.mrb[4].mxu1 %v558_v51  ;;  %v524_v25 = vadd.f32 %v1493_v53, %v485_v44  ;;  %v462_v60 = vmul.f32 %v998_v17, %v1392_v18 }
 0x183   :  { %v306_v10 = vpop.xlane.xlu0 %305  ;;  %1009 = vrsqrt.f32 %v386_v56  ;;  %v370_v63 = vmul.f32 0.03125, %v336_v1  ;;  %v447_v62 = vmul.f32 %v1000_v57, %v1402_v6  ;;  %v539_v18 = vadd.f32 %v1493_v53, %v500_v59 }
 0x184   :  { %v355_v37 = vmul.f32 0.03125, %v306_v10  ;;  %1011 = vrsqrt.f32 %v401_v33  ;;  %v551_v54 = vpack.c.bf16 %v524_v25, %v523_v16  ;;  %v501_v61 = vmul.f32 %v1486_v29, %v462_v60 }
 0x185   :  { %v1002_v19 = vpop.eup %1001  ;;  %v402_v5 = vadd.f32 1e-05, %v370_v63  ;;  %v486_v38 = vmul.f32 %v1486_v29, %v447_v62 }
 0x186   :  { %v387_v2 = vadd.f32 1e-05, %v355_v37  ;;  %v1004_v3 = vpop.eup %1003  ;;  %v308_v4 = vpop.xlane.xlu1 %307  ;;  %904 = vmatprep.mubr.bf16.mxu0 %v551_v54  ;;  %v540_v27 = vadd.f32 %v1493_v53, %v501_v61  ;;  %v448_v13 = vmul.f32 %v1002_v19, %v1406_v20 }
 0x187   :  { %v338_v45 = vpop.xlane.xlu0 %337  ;;  %1013 = vrsqrt.f32 %v402_v5  ;;  %v356_v34 = vmul.f32 0.03125, %v308_v4  ;;  %v463_v6 = vmul.f32 %v1004_v3, %v1416_v9  ;;  %v525_v28 = vadd.f32 %v1493_v53, %v486_v38 }
 0x188   :  { %v371_v32 = vmul.f32 0.03125, %v338_v45  ;;  %1015 = vrsqrt.f32 %v387_v2  ;;  %v559_v35 = vpack.c.bf16 %v540_v27, %v539_v18  ;;  %v487_v36 = vmul.f32 %v1486_v29, %v448_v13  ;;  %v1591_v45 = vld [vmem:[%s1644_s4] ss:$0 sm:$0xff]  ;;  %s1101_s4 = smov [#allocation7]  }
 0x189   :  { %v1006_v21 = vpop.eup %1005  ;;  %v388_v41 = vadd.f32 1e-05, %v356_v34  ;;  %v502_v42 = vmul.f32 %v1486_v29, %v463_v6  ;;  %s832_s23 = sshll.u32 %s1101_s4, 4  ;;  %s833_s23 = int_to_ptr.vmem [resolvable:$true] %s832_s23 }
 0x18a   :  { %v403_v7 = vadd.f32 1e-05, %v371_v32  ;;  %v1008_v47 = vpop.eup %1007  ;;  %v340_v39 = vpop.xlane.xlu1 %339  ;;  %920 = vmatprep.mubr.bf16.mxu1 %v559_v35  ;;  %v526_v20 = vadd.f32 %v1493_v53, %v487_v36  ;;  %v464_v55 = vmul.f32 %v1006_v21, %v1420_v22  ;;  %s1067_s24 = scalar_lea.vmem %s833_s23, 4096  ;;  %p1072_p3 = scmp.lt.s32.totalorder %s833_s23, %s833_s23 }
 0x18b   :  { %1017 = vrsqrt.f32 %v388_v41  ;;  %v372_v9 = vmul.f32 0.03125, %v340_v39  ;;  %v449_v43 = vmul.f32 %v1008_v47, %v1430_v11  ;;  %v541_v0 = vadd.f32 %v1493_v53, %v502_v42  ;;  %p1068_p2 = scmp.ne.s32.totalorder %s833_s23, %s1067_s24  ;;  %p1073_p4 = scmp.lt.s32.totalorder %s1067_s24, %s1067_s24 }
 0x18c   :  { %1019 = vrsqrt.f32 %v403_v7  ;;  %v552_v23 = vpack.c.bf16 %v526_v20, %v525_v28  ;;  %v503_v30 = vmul.f32 %v1486_v29, %v464_v55 }
 0x18d   :  { %v1010_v31 = vpop.eup %1009  ;;  %v404_v14 = vadd.f32 1e-05, %v372_v9  ;;  %v488_v50 = vmul.f32 %v1486_v29, %v449_v43  ;;  %p1074_p5 = por %p1073_p4, %p1072_p3 }
 0x18e   :  { %v1012_v48 = vpop.eup %1011  ;;  %905 = vmatmul.mubr.bf16.gmra.mrb[8].mxu0 %v552_v23  ;;  %v542_v49 = vadd.f32 %v1493_v53, %v503_v30  ;;  %v450_v22 = vmul.f32 %v1010_v31, %v1434_v24 }
 0x18f   :  { %1021 = vrsqrt.f32 %v404_v14  ;;  %v465_v58 = vmul.f32 %v1012_v48, %v1444_v12  ;;  %v527_v17 = vadd.f32 %v1493_v53, %v488_v50  ;;  %p1075_p6 = pnand %p1074_p5, %p1068_p2 }
 0x190   :  { %v560_v11 = vpack.c.bf16 %v542_v49, %v541_v0  ;;  %v489_v52 = vmul.f32 %v1486_v29, %v450_v22 }
 0x191   :  { %v1014_v51 = vpop.eup %1013  ;;  %v504_v57 = vmul.f32 %v1486_v29, %v465_v58 }
 0x192   :  { %v1016_v44 = vpop.eup %1015  ;;  %921 = vmatmul.mubr.bf16.gmra.mrb[8].mxu1 %v560_v11  ;;  %v528_v56 = vadd.f32 %v1493_v53, %v489_v52  ;;  %v466_v33 = vmul.f32 %v1014_v51, %v1448_v26 }
 0x193   :  { %v451_v24 = vmul.f32 %v1016_v44, %v1458_v40  ;;  %v543_v25 = vadd.f32 %v1493_v53, %v504_v57 }
 0x194   :  { %v553_v1 = vpack.c.bf16 %v528_v56, %v527_v17  ;;  %v505_v10 = vmul.f32 %v1486_v29, %v466_v33 }
 0x195   :  { %v1018_v12 = vpop.eup %1017  ;;  %v490_v63 = vmul.f32 %v1486_v29, %v451_v24 }
 0x196   :  { %v1020_v16 = vpop.eup %1019  ;;  %908 = vmatprep.mubr.bf16.mxu0 %v553_v1  ;;  %v544_v60 = vadd.f32 %v1493_v53, %v505_v10  ;;  %v452_v59 = vmul.f32 %v1018_v12, %v1462_v15 }
 0x197   :  { %v467_v26 = vmul.f32 %v1020_v16, %v1472_v46  ;;  %v529_v61 = vadd.f32 %v1493_v53, %v490_v63 }
 0x198   :  { %v561_v37 = vpack.c.bf16 %v544_v60, %v543_v25  ;;  %v491_v54 = vmul.f32 %v1486_v29, %v452_v59 }
 0x199   :  { %v1022_v40 = vpop.eup %1021  ;;  %v506_v5 = vmul.f32 %v1486_v29, %v467_v26 }
 0x19a   :  { %924 = vmatprep.mubr.bf16.mxu1 %v561_v37  ;;  %v530_v62 = vadd.f32 %v1493_v53, %v491_v54  ;;  %v468_v19 = vmul.f32 %v1022_v40, %v1476_v8 }
 0x19b   :  { %v545_v3 = vadd.f32 %v1493_v53, %v506_v5 }
 0x19c   :  { %v554_v2 = vpack.c.bf16 %v530_v62, %v529_v61  ;;  %v507_v15 = vmul.f32 %v1486_v29, %v468_v19 }
 0x19e   :  { %909 = vmatmul.mubr.bf16.gmra.mrb[12].mxu0 %v554_v2  ;;  %v546_v46 = vadd.f32 %v1493_v53, %v507_v15 }
 0x1a0   :  { %v562_v4 = vpack.c.bf16 %v546_v46, %v545_v3 }
 0x1a2   :  { %925 = vmatmul.mubr.bf16.gmra.mrb[12].mxu1 %v562_v4 }
 0x241   :  { %v898_v18 = vpop.f32.mrb[0].mxu0 }
 0x242   :  { %v677_v8 = vadd.f32 %v898_v18, %v1591_v45  ;;  %v668_v27 = vpop.f32.mrb[1].mxu0 }
 0x243   :  { %v669_v13 = vadd.f32 %v1591_v45, %v668_v27  ;;  %v899_v38 = vpop.f32.mrb[2].mxu0 }
 0x244   :  { %797 = vst [vmem:[#allocation7 + $0x10] sm:$0xff] %v677_v8  ;;  %v680_v29 = vadd.f32 %v899_v38, %v1591_v45  ;;  %v671_v34 = vpop.f32.mrb[3].mxu0 }
 0x245   :  { %795 = vst [vmem:[#allocation7] sm:$0xff] %v669_v13  ;;  %v672_v53 = vadd.f32 %v1591_v45, %v671_v34  ;;  %v914_v32 = vpop.f32.mrb[0].mxu1 }
 0x246   :  { %798 = vst [vmem:[#allocation7 + $0x18] sm:$0xff] %v680_v29  ;;  %v741_v6 = vadd.f32 %v914_v32, %v1591_v45  ;;  %v732_v35 = vpop.f32.mrb[1].mxu1 }
 0x247   :  { %796 = vst [vmem:[#allocation7 + $0x8] sm:$0xff] %v672_v53  ;;  %v733_v36 = vadd.f32 %v1591_v45, %v732_v35  ;;  %v915_v21 = vpop.f32.mrb[2].mxu1 }
 0x248   :  { %813 = vst [vmem:[#allocation7 + $0x90] sm:$0xff] %v741_v6  ;;  %v744_v41 = vadd.f32 %v915_v21, %v1591_v45  ;;  %v735_v7 = vpop.f32.mrb[3].mxu1 }
 0x249   :  { %811 = vst [vmem:[#allocation7 + $0x80] sm:$0xff] %v733_v36  ;;  %v736_v47 = vadd.f32 %v1591_v45, %v735_v7 }
 0x24a   :  { %814 = vst [vmem:[#allocation7 + $0x98] sm:$0xff] %v744_v41 }
 0x24b   :  { %812 = vst [vmem:[#allocation7 + $0x88] sm:$0xff] %v736_v47 }
 0x251   :  { %v902_v39 = vpop.f32.mrb[4].mxu0 }
 0x252   :  { %v693_v28 = vadd.f32 %v902_v39, %v1591_v45  ;;  %v684_v20 = vpop.f32.mrb[5].mxu0 }
 0x253   :  { %v685_v55 = vadd.f32 %v1591_v45, %v684_v20  ;;  %v903_v42 = vpop.f32.mrb[6].mxu0 }
 0x254   :  { %801 = vst [vmem:[#allocation7 + $0x30] sm:$0xff] %v693_v28  ;;  %v696_v9 = vadd.f32 %v903_v42, %v1591_v45  ;;  %v687_v43 = vpop.f32.mrb[7].mxu0 }
 0x255   :  { %799 = vst [vmem:[#allocation7 + $0x20] sm:$0xff] %v685_v55  ;;  %v688_v23 = vadd.f32 %v1591_v45, %v687_v43  ;;  %v918_v30 = vpop.f32.mrb[4].mxu1 }
 0x256   :  { %802 = vst [vmem:[#allocation7 + $0x38] sm:$0xff] %v696_v9  ;;  %v757_v31 = vadd.f32 %v918_v30, %v1591_v45  ;;  %v748_v14 = vpop.f32.mrb[5].mxu1 }
 0x257   :  { %800 = vst [vmem:[#allocation7 + $0x28] sm:$0xff] %v688_v23  ;;  %v749_v48 = vadd.f32 %v1591_v45, %v748_v14  ;;  %v919_v0 = vpop.f32.mrb[6].mxu1 }
 0x258   :  { %817 = vst [vmem:[#allocation7 + $0xb0] sm:$0xff] %v757_v31  ;;  %v760_v49 = vadd.f32 %v919_v0, %v1591_v45  ;;  %v751_v22 = vpop.f32.mrb[7].mxu1 }
 0x259   :  { %815 = vst [vmem:[#allocation7 + $0xa0] sm:$0xff] %v749_v48  ;;  %v752_v50 = vadd.f32 %v1591_v45, %v751_v22 }
 0x25a   :  { %818 = vst [vmem:[#allocation7 + $0xb8] sm:$0xff] %v760_v49 }
 0x25b   :  { %816 = vst [vmem:[#allocation7 + $0xa8] sm:$0xff] %v752_v50 }
 0x261   :  { %v906_v58 = vpop.f32.mrb[8].mxu0 }
 0x262   :  { %v709_v11 = vadd.f32 %v906_v58, %v1591_v45  ;;  %v700_v52 = vpop.f32.mrb[9].mxu0 }
 0x263   :  { %v701_v51 = vadd.f32 %v1591_v45, %v700_v52  ;;  %v907_v44 = vpop.f32.mrb[10].mxu0 }
 0x264   :  { %805 = vst [vmem:[#allocation7 + $0x50] sm:$0xff] %v709_v11  ;;  %v712_v17 = vadd.f32 %v907_v44, %v1591_v45  ;;  %v703_v56 = vpop.f32.mrb[11].mxu0 }
 0x265   :  { %803 = vst [vmem:[#allocation7 + $0x40] sm:$0xff] %v701_v51  ;;  %v704_v33 = vadd.f32 %v1591_v45, %v703_v56  ;;  %v922_v57 = vpop.f32.mrb[8].mxu1 }
 0x266   :  { %806 = vst [vmem:[#allocation7 + $0x58] sm:$0xff] %v712_v17  ;;  %v773_v24 = vadd.f32 %v922_v57, %v1591_v45  ;;  %v764_v1 = vpop.f32.mrb[9].mxu1 }
 0x267   :  { %804 = vst [vmem:[#allocation7 + $0x48] sm:$0xff] %v704_v33  ;;  %v765_v10 = vadd.f32 %v1591_v45, %v764_v1  ;;  %v923_v12 = vpop.f32.mrb[10].mxu1 }
 0x268   :  { %821 = vst [vmem:[#allocation7 + $0xd0] sm:$0xff] %v773_v24  ;;  %v776_v16 = vadd.f32 %v923_v12, %v1591_v45  ;;  %v767_v25 = vpop.f32.mrb[11].mxu1 }
 0x269   :  { %819 = vst [vmem:[#allocation7 + $0xc0] sm:$0xff] %v765_v10  ;;  %v768_v60 = vadd.f32 %v1591_v45, %v767_v25 }
 0x26a   :  { %822 = vst [vmem:[#allocation7 + $0xd8] sm:$0xff] %v776_v16 }
 0x26b   :  { %820 = vst [vmem:[#allocation7 + $0xc8] sm:$0xff] %v768_v60 }
 0x271   :  { %v910_v59 = vpop.f32.mrb[12].mxu0 }
 0x272   :  { %v725_v63 = vadd.f32 %v910_v59, %v1591_v45  ;;  %v716_v26 = vpop.f32.mrb[13].mxu0 }
 0x273   :  { %v717_v37 = vadd.f32 %v1591_v45, %v716_v26  ;;  %v911_v54 = vpop.f32.mrb[14].mxu0 }
 0x274   :  { %809 = vst [vmem:[#allocation7 + $0x70] sm:$0xff] %v725_v63  ;;  %v728_v40 = vadd.f32 %v911_v54, %v1591_v45  ;;  %v719_v61 = vpop.f32.mrb[15].mxu0 }
 0x275   :  { %807 = vst [vmem:[#allocation7 + $0x60] sm:$0xff] %v717_v37  ;;  %v720_v62 = vadd.f32 %v1591_v45, %v719_v61  ;;  %v926_v19 = vpop.f32.mrb[12].mxu1 }
 0x276   :  { %810 = vst [vmem:[#allocation7 + $0x78] sm:$0xff] %v728_v40  ;;  %v789_v5 = vadd.f32 %v926_v19, %v1591_v45  ;;  %v780_v2 = vpop.f32.mrb[13].mxu1 }
 0x277   :  { %808 = vst [vmem:[#allocation7 + $0x68] sm:$0xff] %v720_v62  ;;  %v781_v15 = vadd.f32 %v1591_v45, %v780_v2  ;;  %v927_v3 = vpop.f32.mrb[14].mxu1 }
 0x278   :  { %825 = vst [vmem:[#allocation7 + $0xf0] sm:$0xff] %v789_v5  ;;  %v792_v46 = vadd.f32 %v927_v3, %v1591_v45  ;;  %v783_v4 = vpop.f32.mrb[15].mxu1 }
 0x279   :  { %823 = vst [vmem:[#allocation7 + $0xe0] sm:$0xff] %v781_v15  ;;  %v784_v18 = vadd.f32 %v1591_v45, %v783_v4 }
 0x27a   :  { %826 = vst [vmem:[#allocation7 + $0xf8] sm:$0xff] %v792_v46 }
 0x27b   :  { %824 = vst [vmem:[#allocation7 + $0xe8] sm:$0xff] %v784_v18 }
 0x27c   :  { %1078 = shalt.err (!%p1075_p6)
}
 0x27d   :  { %s1079_s27 = scalar_lea.hbm %s1645_s5, 4096 }
 0x27e   :  { %p1080_p7 = scmp.ne.s32.totalorder %s1645_s5, %s1079_s27  ;;  %p1083_p8 = scmp.lt.u32.totalorder %s1079_s27, %s1645_s5 }
 0x280   :  { %p1085_p9 = pnand %p1083_p8, %p1080_p7 }
 0x282   :  { %1088 = shalt.err (!%p1085_p9)
}
 0x283   :  { %838 = dma.vmem_to_hbm [thread:$0]  %s833_s23, 4096, %s1645_s5, [#allocation4], %s1096_s28, %s1096_s28, %s1097_s29  }
 0x284   :  { %1093 = dma.done.wait [#allocation4], 4096  }
 0x285   :  { %1094 = vsyncadd [#allocation4], 4294963200 }
 0x286   :  { %842 = vsyncpa [#allocation3], 1 }
 0x287   :  { %843 = vsyncpa [#allocation6], 1 }
 0x288   :  { %844 = vsyncpa [#allocation4], 1 }

</bundles_post_ra>
